<compile_context>
chip_gen: v6e
topology: v6e:2x2x1
jax: 0.10.0
libtpu: 0.0.40
codegen_flags: <defaults>
</compile_context>

<pallas_src>
from functools import partial

import jax
import jax.numpy as jnp
from jax.experimental import pallas as pl
from jax.experimental.pallas import tpu as pltpu


def _silu(v):
    return v * jax.nn.sigmoid(v)


def _decoder_block_kernel(a_ref, y_ref, wdw_ref, s2_ref, b2_ref,
                          w2_ref, s3_ref, b3_ref, o_ref, *, cy):
    """One (batch, row-tile) grid step.

    a_ref : (1, 1, th+2, W*Cy) bf16  pre-SiLU x_to_y activation (1-row halo)
    y_ref : (1, 1, th+2, W*Cy) bf16  skip feature, same halo window
    wdw_ref:(9, W*Cy)          f32   depthwise 3x3 taps, tiled over W,
                                     boundary taps pre-zeroed (W edges)
    s2/b2 : (1, W*Cy)          f32   folded BN2 scale / shift (tiled over W)
    w2_ref: (W*Cy, W*Cout)     bf16  kron(I_W, w2): 1x1 conv in flat layout
    s3/b3 : (1, W*Cout)        f32   folded BN3 scale / shift (tiled over W)
    o_ref : (1, 1, th, W*Cout) f32
    """
    hp = a_ref.shape[2]            # th + 2
    L = a_ref.shape[3]             # W * Cy
    th = hp - 2

    a = a_ref[0, 0].astype(jnp.float32)
    y = y_ref[0, 0].astype(jnp.float32)
    # z = SiLU(BN1(conv1x1(resize(x)))) + y.  Halo rows at the image border are
    # zero inputs, so z's halo is exactly the depthwise conv's zero padding
    # (SiLU(0) + 0 == 0); interior halo rows carry real neighbour data.
    z = _silu(a) + y                                           # (hp, L) f32

    # ---- depthwise 3x3, fully in vregs --------------------------------------
    # W-direction neighbours via single lane rotations (XLU).  Lanes that wrap
    # around the W boundary are multiplied by taps that were zeroed in the
    # wrapper, so no in-kernel masking is needed.
    z_wm = pltpu.roll(z, cy, axis=1)        # value at w-1 (jnp.roll semantics)
    z_wp = pltpu.roll(z, L - cy, axis=1)    # value at w+1 (== roll by -cy)
    cols = (z_wm, z, z_wp)

    wdw = wdw_ref[...]                                         # (9, L)
    # Three full-height partials (one per H offset), then two shifted adds.
    parts = []
    for di in range(3):
        t = (cols[0] * wdw[3 * di + 0:3 * di + 1, :]
             + cols[1] * wdw[3 * di + 1:3 * di + 2, :]
             + cols[2] * wdw[3 * di + 2:3 * di + 3, :])
        parts.append(t)
    d = parts[0][0:th, :] + parts[1][1:th + 1, :] + parts[2][2:th + 2, :]

    # ---- folded BN2 + SiLU (f32 on VPU / EUP) --------------------------------
    d = d * s2_ref[...] + b2_ref[...]
    d = _silu(d)

    # ---- 1x1 conv to out_ch: lane-dense MXU matmul, bf16 in / f32 accum ------
    out = jnp.dot(d.astype(jnp.bfloat16), w2_ref[...],
                  preferred_element_type=jnp.float32)          # (th, W*Cout)
    out = out * s3_ref[...] + b3_ref[...]                      # folded BN3
    o_ref[0, 0] = out.astype(o_ref.dtype)


def decoder_block_forward(x_nchw, y_nchw, params, *, row_budget_bytes=20 << 20):
    """x: (N, x_ch, Hx, Wx), y: (N, y_ch, H, W) -> (N, out_ch, H, W)."""
    N, Cx, Hx, Wx = x_nchw.shape
    _, Cy, H, W = y_nchw.shape
    Cout = params["w2"].shape[1]
    L_in, L_out = W * Cy, W * Cout

    # ---- Stage 1 (XLA): x_to_y conv1x1 + BN1-scale at LOW resolution, then
    # bilinear resize; the BN1 shift is added afterwards.  This equals the
    # module's conv(resize(x)) because conv1x1 / per-channel scale commute with
    # the per-channel, spatially-linear bilinear resize.
    # TODO(synk): torchvision F.resize defaults to antialias bilinear; identical
    # for upsampling (the standard decoder use-case exercised here).
    w1s = params["w1"] * params["s1"][None, :]                 # fold BN1 scale
    x_nhwc = jnp.transpose(x_nchw, (0, 2, 3, 1))               # low-res (cheap)
    a_low = jnp.einsum("nhwc,cd->nhwd", x_nhwc, w1s)           # (N,Hx,Wx,Cy)
    a = jax.image.resize(a_low, (N, H, W, Cy), method="bilinear")
    a = a + params["b1"]                                       # BN1 shift

    # ---- Lane-dense flattened layout (N, H, W*C). ----------------------------
    a_f = a.reshape(N, H, L_in)
    y_f = jnp.transpose(y_nchw, (0, 2, 3, 1)).reshape(N, H, L_in)

    # ---- Row tiling: whole image per grid step when it fits the VMEM budget
    # (no halo duplication, few large steps); otherwise fall back to
    # overlapping halo tiles gathered in XLA.
    def step_bytes(th):  # double-buffered bf16 inputs + f32 output per step
        return 2 * 2 * (th + 2) * L_in * 2 + 2 * th * L_out * 4

    if step_bytes(H) <= row_budget_bytes:
        th, nt = H, 1
    else:
        cands = [d for d in range(1, H) if H % d == 0
                 and step_bytes(d) <= row_budget_bytes]
        th = max(cands, key=lambda d: (((d + 2) % 8) == 0, d)) if cands else 1
        nt = H // th

    def tile_rows_with_halo(t):                                # (N,H,L)->(N,nt,th+2,L)
        tp = jnp.pad(t, ((0, 0), (1, 1), (0, 0)))
        if nt == 1:
            return tp[:, None].astype(jnp.bfloat16)            # no duplication
        rows = jnp.arange(nt)[:, None] * th + jnp.arange(th + 2)[None, :]
        return tp[:, rows, :].astype(jnp.bfloat16)

    a_t = tile_rows_with_halo(a_f)
    y_t = tile_rows_with_halo(y_f)

    # ---- Per-lane parameter vectors (tiled over W).  The W-boundary taps of
    # the depthwise kernel are zeroed here so the in-kernel lane rolls need no
    # masking: rows {0,3,6} (w-1 taps) die on the w=0 lanes, rows {2,5,8}
    # (w+1 taps) die on the w=W-1 lanes.
    wdw_t = jnp.tile(params["wdw"].reshape(9, Cy), (1, W))     # (9, W*Cy)
    lane_w = jnp.arange(L_in) // Cy
    dj = jnp.arange(9) % 3
    keep = jnp.where((dj[:, None] == 0) & (lane_w[None, :] == 0), 0.0, 1.0)
    keep = keep * jnp.where((dj[:, None] == 2) & (lane_w[None, :] == W - 1), 0.0, 1.0)
    wdw_t = (wdw_t * keep).astype(jnp.float32)

    s2_t = jnp.tile(params["s2"], W).reshape(1, L_in)
    b2_t = jnp.tile(params["b2"], W).reshape(1, L_in)
    s3_t = jnp.tile(params["s3"], W).reshape(1, L_out)
    b3_t = jnp.tile(params["b3"], W).reshape(1, L_out)
    # Block-diagonal weight implementing the 1x1 conv in the flat W*C layout.
    # TODO(synk): for large W, replace kron(I_W, w2) (O(W^2) resident weight and
    # W-fold MXU FLOP inflation) with per-W-block weight slices or a lane=C
    # layout once C >= 128; at the shapes here it is 64 KB and irrelevant.
    w2_big = jnp.kron(jnp.eye(W, dtype=params["w2"].dtype),
                      params["w2"]).astype(jnp.bfloat16)       # (W*Cy, W*Cout)

    # ---- VMEM budget / cost hint. --------------------------------------------
    w2_bytes = L_in * L_out * 2
    param_bytes = (9 + 2) * L_in * 4 + 2 * L_out * 4
    vmem_est = step_bytes(th) + w2_bytes + param_bytes
    vmem_limit = int(min(max(2 * vmem_est + (8 << 20), 16 << 20), 48 << 20))

    cost = pl.CostEstimate(
        flops=2 * N * H * (9 * L_in + L_in * L_out),
        transcendentals=2 * N * H * L_in,
        bytes_accessed=(2 * 2 * N * nt * (th + 2) * L_in       # bf16 a, y
                        + 4 * N * H * L_out                    # f32 output
                        + w2_bytes + param_bytes),
    )

    out_t = pl.pallas_call(
        partial(_decoder_block_kernel, cy=Cy),
        out_shape=jax.ShapeDtypeStruct((N, nt, th, L_out), jnp.float32),
        grid_spec=pltpu.PrefetchScalarGridSpec(
            num_scalar_prefetch=0,
            grid=(N, nt),
            in_specs=[
                pl.BlockSpec((1, 1, th + 2, L_in), lambda n, t: (n, t, 0, 0)),
                pl.BlockSpec((1, 1, th + 2, L_in), lambda n, t: (n, t, 0, 0)),
                pl.BlockSpec((9, L_in), lambda n, t: (0, 0)),
                pl.BlockSpec((1, L_in), lambda n, t: (0, 0)),
                pl.BlockSpec((1, L_in), lambda n, t: (0, 0)),
                pl.BlockSpec((L_in, L_out), lambda n, t: (0, 0)),
                pl.BlockSpec((1, L_out), lambda n, t: (0, 0)),
                pl.BlockSpec((1, L_out), lambda n, t: (0, 0)),
            ],
            out_specs=pl.BlockSpec((1, 1, th, L_out), lambda n, t: (n, t, 0, 0)),
        ),
        compiler_params=pltpu.CompilerParams(
            dimension_semantics=("parallel", "parallel"),
            vmem_limit_bytes=vmem_limit,
        ),
        cost_estimate=cost,
    )(a_t, y_t, wdw_t, s2_t, b2_t, w2_big, s3_t, b3_t)

    # (N, nt, th, W*Cout) -> (N, H, W, Cout) -> NCHW (public PyTorch layout).
    # Keeping the model NHWC end-to-end would remove this final transpose.
    out = out_t.reshape(N, H, W, Cout)
    return jnp.transpose(out, (0, 3, 1, 2))


def init_params(key, x_ch, y_ch, out_ch, eps=1e-3):
    ks = jax.random.split(key, 6)
    w1 = 0.1 * jax.random.normal(ks[0], (x_ch, y_ch), jnp.float32)
    wdw = 0.1 * jax.random.normal(ks[1], (3, 3, y_ch), jnp.float32)
    w2 = 0.1 * jax.random.normal(ks[2], (y_ch, out_ch), jnp.float32)

    def folded_bn(k, c):   # inference-mode BN folded to scale/shift
        gamma = 1.0 + 0.1 * jax.random.normal(k, (c,), jnp.float32)
        beta = 0.1 * jax.random.normal(jax.random.fold_in(k, 1), (c,), jnp.float32)
        mean = jnp.zeros((c,), jnp.float32)
        var = jnp.ones((c,), jnp.float32)
        scale = gamma / jnp.sqrt(var + eps)
        shift = beta - mean * scale
        return scale, shift

    s1, b1 = folded_bn(ks[3], y_ch)
    s2, b2 = folded_bn(ks[4], y_ch)
    s3, b3 = folded_bn(ks[5], out_ch)
    return dict(w1=w1, wdw=wdw, w2=w2, s1=s1, b1=b1, s2=s2, b2=b2, s3=s3, b3=b3)


def decoder_block_reference(x_nchw, y_nchw, p):
    """Pure-JAX f32 reference in the original module order."""
    N, Cx, _, _ = x_nchw.shape
    _, Cy, H, W = y_nchw.shape
    xr = jax.image.resize(x_nchw, (N, Cx, H, W), method="bilinear")
    xh = jnp.transpose(xr, (0, 2, 3, 1))
    yh = jnp.transpose(y_nchw, (0, 2, 3, 1))
    a = jnp.einsum("nhwc,cd->nhwd", xh, p["w1"]) * p["s1"] + p["b1"]
    a = a * jax.nn.sigmoid(a)
    z = a + yh
    zp = jnp.pad(z, ((0, 0), (1, 1), (1, 1), (0, 0)))
    d = sum(zp[:, di:di + H, dj:dj + W, :] * p["wdw"][di, dj]
            for di in range(3) for dj in range(3))
    d = d * p["s2"] + p["b2"]
    d = d * jax.nn.sigmoid(d)
    o = jnp.einsum("nhwc,cd->nhwd", d, p["w2"]) * p["s3"] + p["b3"]
    return jnp.transpose(o, (0, 3, 1, 2))


if __name__ == "__main__":
    key = jax.random.PRNGKey(0)
    kx, ky, kp = jax.random.split(key, 3)

    N, x_ch, y_ch, out_ch = 2, 4, 8, 16
    Hy, Wy = 16, 16
    x = jax.random.normal(kx, (N, x_ch, 8, 8), jnp.float32)      # low-res input
    y = jax.random.normal(ky, (N, y_ch, Hy, Wy), jnp.float32)    # skip feature
    params = init_params(kp, x_ch, y_ch, out_ch)

    out = jax.block_until_ready(decoder_block_forward(x, y, params))
    ref = decoder_block_reference(x, y, params)

    assert out.shape == (N, out_ch, Hy, Wy), out.shape
    # bf16 activations / MXU operands inside the kernel => small deviation vs f32 ref.
    max_err = float(jnp.max(jnp.abs(out - ref)))
    assert jnp.allclose(out, ref, atol=2e-2, rtol=2e-2), f"mismatch, max_err={max_err}"

    print("KERNEL_OK")
</pallas_src>

<mosaic_0001>
module attributes {stable_mosaic.version = 11 : i64} {
  func.func @_decoder_block_kernel(%arg0: i32, %arg1: i32, %arg2: memref<1x1x18x128xbf16, #tpu.memory_space<vmem>>, %arg3: memref<1x1x18x128xbf16, #tpu.memory_space<vmem>>, %arg4: memref<9x128xf32, #tpu.memory_space<vmem>>, %arg5: memref<1x128xf32, #tpu.memory_space<vmem>>, %arg6: memref<1x128xf32, #tpu.memory_space<vmem>>, %arg7: memref<128x256xbf16, #tpu.memory_space<vmem>>, %arg8: memref<1x256xf32, #tpu.memory_space<vmem>>, %arg9: memref<1x256xf32, #tpu.memory_space<vmem>>, %arg10: memref<1x1x16x256xf32, #tpu.memory_space<vmem>>) attributes {dimension_semantics = [#tpu.dimension_semantics<parallel>, #tpu.dimension_semantics<parallel>], iteration_bounds = array<i64: 2, 1>, scalar_prefetch = 0 : i64, scratch_operands = 0 : i64, tpu.core_type = #tpu.core_type<tc>, window_params = [{transform_indices = @transform_0, window_bounds = array<i64: 1, 1, 18, 128>}, {transform_indices = @transform_1, window_bounds = array<i64: 1, 1, 18, 128>}, {pipeline_mode = #tpu.pipeline_mode<synchronous>, transform_indices = @transform_2, window_bounds = array<i64: 9, 128>}, {pipeline_mode = #tpu.pipeline_mode<synchronous>, transform_indices = @transform_3, window_bounds = array<i64: 1, 128>}, {pipeline_mode = #tpu.pipeline_mode<synchronous>, transform_indices = @transform_4, window_bounds = array<i64: 1, 128>}, {pipeline_mode = #tpu.pipeline_mode<synchronous>, transform_indices = @transform_5, window_bounds = array<i64: 128, 256>}, {pipeline_mode = #tpu.pipeline_mode<synchronous>, transform_indices = @transform_6, window_bounds = array<i64: 1, 256>}, {pipeline_mode = #tpu.pipeline_mode<synchronous>, transform_indices = @transform_7, window_bounds = array<i64: 1, 256>}, {transform_indices = @transform_8, window_bounds = array<i64: 1, 1, 16, 256>}]} {
    %c0 = arith.constant 0 : index
    %c0_0 = arith.constant 0 : index
    %c0_1 = arith.constant 0 : index
    %c0_2 = arith.constant 0 : index
    %0 = vector.load %arg2[%c0, %c0_0, %c0_1, %c0_2] : memref<1x1x18x128xbf16, #tpu.memory_space<vmem>>, vector<1x1x18x128xbf16>
    %1 = vector.shape_cast %0 : vector<1x1x18x128xbf16> to vector<18x128xbf16>
    %2 = arith.extf %1 : vector<18x128xbf16> to vector<18x128xf32>
    %c0_3 = arith.constant 0 : index
    %c0_4 = arith.constant 0 : index
    %c0_5 = arith.constant 0 : index
    %c0_6 = arith.constant 0 : index
    %3 = vector.load %arg3[%c0_3, %c0_4, %c0_5, %c0_6] : memref<1x1x18x128xbf16, #tpu.memory_space<vmem>>, vector<1x1x18x128xbf16>
    %4 = vector.shape_cast %3 : vector<1x1x18x128xbf16> to vector<18x128xbf16>
    %5 = arith.extf %4 : vector<18x128xbf16> to vector<18x128xf32>
    %6 = arith.negf %2 : vector<18x128xf32>
    %7 = math.exp %6 : vector<18x128xf32>
    %cst = arith.constant 1.000000e+00 : f32
    %8 = vector.broadcast %cst : f32 to vector<18x128xf32>
    %9 = arith.addf %8, %7 : vector<18x128xf32>
    %10 = arith.divf %8, %9 : vector<18x128xf32>
    %11 = arith.mulf %2, %10 : vector<18x128xf32>
    %12 = arith.addf %11, %5 : vector<18x128xf32>
    %c8_i32 = arith.constant 8 : i32
    %13 = tpu.dynamic_rotate %12 by %c8_i32 dim 1 : vector<18x128xf32>, i32 -> vector<18x128xf32>
    %c120_i32 = arith.constant 120 : i32
    %14 = tpu.dynamic_rotate %12 by %c120_i32 dim 1 : vector<18x128xf32>, i32 -> vector<18x128xf32>
    %c0_7 = arith.constant 0 : index
    %c0_8 = arith.constant 0 : index
    %15 = vector.load %arg4[%c0_7, %c0_8] : memref<9x128xf32, #tpu.memory_space<vmem>>, vector<9x128xf32>
    %16 = vector.extract_strided_slice %15 {offsets = [0, 0], sizes = [1, 128], strides = [1, 1]} : vector<9x128xf32> to vector<1x128xf32>
    %17 = vector.broadcast %16 : vector<1x128xf32> to vector<18x128xf32>
    %18 = arith.mulf %13, %17 : vector<18x128xf32>
    %19 = vector.extract_strided_slice %15 {offsets = [1, 0], sizes = [1, 128], strides = [1, 1]} : vector<9x128xf32> to vector<1x128xf32>
    %20 = vector.broadcast %19 : vector<1x128xf32> to vector<18x128xf32>
    %21 = arith.mulf %12, %20 : vector<18x128xf32>
    %22 = arith.addf %18, %21 : vector<18x128xf32>
    %23 = vector.extract_strided_slice %15 {offsets = [2, 0], sizes = [1, 128], strides = [1, 1]} : vector<9x128xf32> to vector<1x128xf32>
    %24 = vector.broadcast %23 : vector<1x128xf32> to vector<18x128xf32>
    %25 = arith.mulf %14, %24 : vector<18x128xf32>
    %26 = arith.addf %22, %25 : vector<18x128xf32>
    %27 = vector.extract_strided_slice %15 {offsets = [3, 0], sizes = [1, 128], strides = [1, 1]} : vector<9x128xf32> to vector<1x128xf32>
    %28 = vector.broadcast %27 : vector<1x128xf32> to vector<18x128xf32>
    %29 = arith.mulf %13, %28 : vector<18x128xf32>
    %30 = vector.extract_strided_slice %15 {offsets = [4, 0], sizes = [1, 128], strides = [1, 1]} : vector<9x128xf32> to vector<1x128xf32>
    %31 = vector.broadcast %30 : vector<1x128xf32> to vector<18x128xf32>
    %32 = arith.mulf %12, %31 : vector<18x128xf32>
    %33 = arith.addf %29, %32 : vector<18x128xf32>
    %34 = vector.extract_strided_slice %15 {offsets = [5, 0], sizes = [1, 128], strides = [1, 1]} : vector<9x128xf32> to vector<1x128xf32>
    %35 = vector.broadcast %34 : vector<1x128xf32> to vector<18x128xf32>
    %36 = arith.mulf %14, %35 : vector<18x128xf32>
    %37 = arith.addf %33, %36 : vector<18x128xf32>
    %38 = vector.extract_strided_slice %15 {offsets = [6, 0], sizes = [1, 128], strides = [1, 1]} : vector<9x128xf32> to vector<1x128xf32>
    %39 = vector.broadcast %38 : vector<1x128xf32> to vector<18x128xf32>
    %40 = arith.mulf %13, %39 : vector<18x128xf32>
    %41 = vector.extract_strided_slice %15 {offsets = [7, 0], sizes = [1, 128], strides = [1, 1]} : vector<9x128xf32> to vector<1x128xf32>
    %42 = vector.broadcast %41 : vector<1x128xf32> to vector<18x128xf32>
    %43 = arith.mulf %12, %42 : vector<18x128xf32>
    %44 = arith.addf %40, %43 : vector<18x128xf32>
    %45 = vector.extract_strided_slice %15 {offsets = [8, 0], sizes = [1, 128], strides = [1, 1]} : vector<9x128xf32> to vector<1x128xf32>
    %46 = vector.broadcast %45 : vector<1x128xf32> to vector<18x128xf32>
    %47 = arith.mulf %14, %46 : vector<18x128xf32>
    %48 = arith.addf %44, %47 : vector<18x128xf32>
    %49 = vector.extract_strided_slice %26 {offsets = [0, 0], sizes = [16, 128], strides = [1, 1]} : vector<18x128xf32> to vector<16x128xf32>
    %50 = vector.extract_strided_slice %37 {offsets = [1, 0], sizes = [16, 128], strides = [1, 1]} : vector<18x128xf32> to vector<16x128xf32>
    %51 = arith.addf %49, %50 : vector<16x128xf32>
    %52 = vector.extract_strided_slice %48 {offsets = [2, 0], sizes = [16, 128], strides = [1, 1]} : vector<18x128xf32> to vector<16x128xf32>
    %53 = arith.addf %51, %52 : vector<16x128xf32>
    %c0_9 = arith.constant 0 : index
    %c0_10 = arith.constant 0 : index
    %54 = vector.load %arg5[%c0_9, %c0_10] : memref<1x128xf32, #tpu.memory_space<vmem>>, vector<1x128xf32>
    %55 = vector.broadcast %54 : vector<1x128xf32> to vector<16x128xf32>
    %56 = arith.mulf %53, %55 : vector<16x128xf32>
    %c0_11 = arith.constant 0 : index
    %c0_12 = arith.constant 0 : index
    %57 = vector.load %arg6[%c0_11, %c0_12] : memref<1x128xf32, #tpu.memory_space<vmem>>, vector<1x128xf32>
    %58 = vector.broadcast %57 : vector<1x128xf32> to vector<16x128xf32>
    %59 = arith.addf %56, %58 : vector<16x128xf32>
    %60 = arith.negf %59 : vector<16x128xf32>
    %61 = math.exp %60 : vector<16x128xf32>
    %cst_13 = arith.constant 1.000000e+00 : f32
    %62 = vector.broadcast %cst_13 : f32 to vector<16x128xf32>
    %63 = arith.addf %62, %61 : vector<16x128xf32>
    %64 = arith.divf %62, %63 : vector<16x128xf32>
    %65 = arith.mulf %59, %64 : vector<16x128xf32>
    %66 = arith.truncf %65 : vector<16x128xf32> to vector<16x128xbf16>
    %c0_14 = arith.constant 0 : index
    %c0_15 = arith.constant 0 : index
    %67 = vector.load %arg7[%c0_14, %c0_15] : memref<128x256xbf16, #tpu.memory_space<vmem>>, vector<128x256xbf16>
    %cst_16 = arith.constant dense<0.000000e+00> : vector<16x256xf32>
    %68 = tpu.matmul %66, %67, %cst_16 {dimension_numbers = #tpu.dot_dimension_numbers<[1], [0], [0], [1], [0, 0, 1, 1], [], []>} : vector<16x128xbf16>, vector<128x256xbf16>, vector<16x256xf32> -> vector<16x256xf32>
    %c0_17 = arith.constant 0 : index
    %c0_18 = arith.constant 0 : index
    %69 = vector.load %arg8[%c0_17, %c0_18] : memref<1x256xf32, #tpu.memory_space<vmem>>, vector<1x256xf32>
    %70 = vector.broadcast %69 : vector<1x256xf32> to vector<16x256xf32>
    %71 = arith.mulf %68, %70 : vector<16x256xf32>
    %c0_19 = arith.constant 0 : index
    %c0_20 = arith.constant 0 : index
    %72 = vector.load %arg9[%c0_19, %c0_20] : memref<1x256xf32, #tpu.memory_space<vmem>>, vector<1x256xf32>
    %73 = vector.broadcast %72 : vector<1x256xf32> to vector<16x256xf32>
    %74 = arith.addf %71, %73 : vector<16x256xf32>
    %c0_21 = arith.constant 0 : index
    %c0_22 = arith.constant 0 : index
    %c0_23 = arith.constant 0 : index
    %c0_24 = arith.constant 0 : index
    %75 = vector.load %arg10[%c0_21, %c0_22, %c0_23, %c0_24] : memref<1x1x16x256xf32, #tpu.memory_space<vmem>>, vector<1x1x16x256xf32>
    %76 = vector.shape_cast %75 : vector<1x1x16x256xf32> to vector<16x256xf32>
    %77 = vector.shape_cast %74 : vector<16x256xf32> to vector<1x1x16x256xf32>
    tpu.vector_store %arg10[%c0_21, %c0_22, %c0_23, %c0_24], %77 {strides = array<i32>} : memref<1x1x16x256xf32, #tpu.memory_space<vmem>>, vector<1x1x16x256xf32>,
    return
  }
  func.func @transform_0(%arg0: i32, %arg1: i32) -> (i32, i32, i32, i32) {
    %c0_i32 = arith.constant 0 : i32
    %c0_i32_0 = arith.constant 0 : i32
    %c0_i32_1 = arith.constant 0 : i32
    return %arg0, %arg1, %c0_i32, %c0_i32_0 : i32, i32, i32, i32
  }
  func.func @transform_1(%arg0: i32, %arg1: i32) -> (i32, i32, i32, i32) {
    %c0_i32 = arith.constant 0 : i32
    %c0_i32_0 = arith.constant 0 : i32
    %c0_i32_1 = arith.constant 0 : i32
    return %arg0, %arg1, %c0_i32, %c0_i32_0 : i32, i32, i32, i32
  }
  func.func @transform_2(%arg0: i32, %arg1: i32) -> (i32, i32) {
    %c0_i32 = arith.constant 0 : i32
    %c0_i32_0 = arith.constant 0 : i32
    %c0_i32_1 = arith.constant 0 : i32
    return %c0_i32, %c0_i32_0 : i32, i32
  }
  func.func @transform_3(%arg0: i32, %arg1: i32) -> (i32, i32) {
    %c0_i32 = arith.constant 0 : i32
    %c0_i32_0 = arith.constant 0 : i32
    %c0_i32_1 = arith.constant 0 : i32
    return %c0_i32, %c0_i32_0 : i32, i32
  }
  func.func @transform_4(%arg0: i32, %arg1: i32) -> (i32, i32) {
    %c0_i32 = arith.constant 0 : i32
    %c0_i32_0 = arith.constant 0 : i32
    %c0_i32_1 = arith.constant 0 : i32
    return %c0_i32, %c0_i32_0 : i32, i32
  }
  func.func @transform_5(%arg0: i32, %arg1: i32) -> (i32, i32) {
    %c0_i32 = arith.constant 0 : i32
    %c0_i32_0 = arith.constant 0 : i32
    %c0_i32_1 = arith.constant 0 : i32
    return %c0_i32, %c0_i32_0 : i32, i32
  }
  func.func @transform_6(%arg0: i32, %arg1: i32) -> (i32, i32) {
    %c0_i32 = arith.constant 0 : i32
    %c0_i32_0 = arith.constant 0 : i32
    %c0_i32_1 = arith.constant 0 : i32
    return %c0_i32, %c0_i32_0 : i32, i32
  }
  func.func @transform_7(%arg0: i32, %arg1: i32) -> (i32, i32) {
    %c0_i32 = arith.constant 0 : i32
    %c0_i32_0 = arith.constant 0 : i32
    %c0_i32_1 = arith.constant 0 : i32
    return %c0_i32, %c0_i32_0 : i32, i32
  }
  func.func @transform_8(%arg0: i32, %arg1: i32) -> (i32, i32, i32, i32) {
    %c0_i32 = arith.constant 0 : i32
    %c0_i32_0 = arith.constant 0 : i32
    %c0_i32_1 = arith.constant 0 : i32
    return %arg0, %arg1, %c0_i32, %c0_i32_0 : i32, i32, i32, i32
  }
}

</mosaic_0001>

<bundles_post_ra>
// kernel: tpu_custom_call.1
= control target key start
LH: loop header
LB: loop body
LE: loop exit
PB: predicated region body
PF: predicated region fallthrough
CT: control target
= control target key end

     0   :  { %13 = vsyncpa [#allocation3], 0  ;;  %s1389_s0 = inlined_call_operand.vmem [shape: bf16[2,1,18,128], index: 0, kind: input, shape index: {}]   ;;  %s1390_s1 = inlined_call_operand.vmem [shape: bf16[2,1,18,128], index: 1, kind: input, shape index: {}]   ;;  %s1391_s2 = inlined_call_operand.vmem [shape: f32[9,128], index: 2, kind: input, shape index: {}]   ;;  %s1392_s3 = inlined_call_operand.vmem [shape: f32[1,128], index: 3, kind: input, shape index: {}]   ;;  %s1393_s4 = inlined_call_operand.vmem [shape: f32[1,128], index: 4, kind: input, shape index: {}]   ;;  %s1394_s5 = inlined_call_operand.hbm [shape: bf16[128,256], index: 5, kind: input, shape index: {}]   ;;  %s1395_s6 = inlined_call_operand.vmem [shape: f32[1,256], index: 6, kind: input, shape index: {}]   ;;  %s1396_s7 = inlined_call_operand.vmem [shape: f32[1,256], index: 7, kind: input, shape index: {}]   ;;  %s1397_s8 = inlined_call_operand.hbm [shape: f32[2,1,16,256], index: 8, kind: output, shape index: {}]  }
   0x1   :  { %14 = vsyncpa [#allocation4], 0 }
   0x2   :  { %16 = vsyncpa [#allocation4 + $0x1], 0  ;;  %s1201_s27 = smov 0   ;;  %s1203_s28 = smov 0  }
   0x3   :  { %s1205_s29 = smov 0   ;;  %s1207_s30 = smov 0  }
   0x4   :  { %s1209_s9 = smov 0   ;;  %s1211_s10 = smov 0  }
   0x5 LB: > { %s873_s11 = sadd.s32 4294967295, %s1145_s10   ;;  %s874_s12 = sadd.s32 4294967294, %s1145_s10   ;;  %s1145_s10 = sphi %s1211_s10, %s22_s10   ;;  %s1141_s9 = sphi %s1209_s9, %s1406_s9   ;;  %s1137_s30 = sphi %s1207_s30, %s1405_s30   ;;  %s1133_s29 = sphi %s1205_s29, %s1404_s29   ;;  %s1129_s28 = sphi %s1203_s28, %s1403_s28   ;;  %s1125_s27 = sphi %s1201_s27, %s1402_s27  }
   0x6   : > { %s34_s13 = sadd.s32 1, %s1141_s9  ;;  %s225_s14 = sadd.s32 1, %s1133_s29 }
   0x7   : > { %p36_p0 = scmp.ge.s32.totalorder %s34_s13, 2  ;;  %p235_p1 = scmp.ne.s32.totalorder %s1133_s29, %s1129_s28 }
   0x8   : > { %p236_p2 = scmp.eq.s32.totalorder %s873_s11, 1  ;;  %p241_p3 = scmp.ne.s32.totalorder %s1129_s28, %s1125_s27 }
   0x9   : > { %s1408_s13 = smov (%p36_p0, %s34_s13), 0  ;;  %p242_p5 = scmp.eq.s32.totalorder %s874_s12, 1 }
   0xa   : > { %p1241_p4 = por %p236_p2, %p235_p1  ;;  %s220_s16 = ssub.s32 %s1141_s9, %s1408_s13 }
   0xb   : > { %p875_p6 = scmp.ge.s32.totalorder %s1145_s10, 1  ;;  %p223_p7 = scmp.eq.s32.totalorder %s220_s16, 0 }
   0xc   : > { %p1248_p8 = por %p242_p5, %p241_p3  ;;  %p249_p9 = scmp.lt.s32.totalorder %s1145_s10, 3 }
   0xd   : > { %s1254_s18 = scalar_select %p223_p7, %s1133_s29, %s225_s14  }
   0xe   : > { %p1256_p10 = pnand %p875_p6, %p249_p9  ;;  %p1260_p11 = scmp.eq.s32.totalorder %s873_s11, 0 }
   0xf   : > { %s1147_s21 = smov [#allocation2]  }
  0x10   : > { %p928_p12 = pneg %p1256_p10  ;;  %s270_s22 = sshll.u32 %s1147_s21, 4  ;;  %s271_s22 = int_to_ptr.vmem [resolvable:$true] %s270_s22 }
  0x11   : > { %s1050_s23 = scalar_lea.vmem %s271_s22, 2048  ;;  %p1058_p5 = scmp.lt.s32.totalorder %s271_s22, %s271_s22 }
  0x12   : > { %p929_p13 = pnand %p1260_p11, %p928_p12  ;;  %p1051_p1 = scmp.ne.s32.totalorder %s271_s22, %s1050_s23 }
  0x13   : > { %p1059_p6 = scmp.lt.s32.totalorder %s1050_s23, %s1050_s23 }
  0x14   : > { %p1041_p0 = pneg %p929_p13 }
  0x15   : > { %p1060_p7 = por %p1059_p6, %p1058_p5 }
  0x16   : > { %p1053_p2 = pnand %p1051_p1, %p1041_p0 }
  0x18   : > { %p1054_p3 = pneg %p1053_p2 }
  0x1a   : > { %p1061_p9 = pnand %p1060_p7, %p1054_p3 }
  0x1c   : > { %1064 = shalt.err (!%p1061_p9)
}
  0x1d   : > { %s1148_s24 = smov 128   ;;  %s1149_s25 = smov 8  }
  0x1e   : > { %931 = dma.hbm_to_vmem [thread:$0]  (!%p929_p13), %s1394_s5, 2048, %s271_s22, [#allocation3], %s1148_s24, %s1148_s24, %s1149_s25  }
  0x1f   : > { %316 = sbr.rel (%p1256_p10) target bundleno = 476 (0x1dc), region = 52 }
  0x24   : > { %1116 = dma.done.wait (%p1260_p11), [#allocation3], 2048  }
  0x25   : > { %1118 = vsyncadd (%p1260_p11), [#allocation3], 4294965248  ;;  %p363_p12 = scmp.lt.s32.totalorder %s1137_s30, 1  ;;  %s1150_s24 = smov 8   ;;  %v995_v28 = vld [vmem:[#allocation2 + $0x74] ss:$8 sps:$4 sm:$0xff]   ;;  %v432_v45 = vlaneseq }
  0x26   : > { %s1151_s25 = smov 120   ;;  %v997_v29 = vld [vmem:[#allocation2 + $0x70] ss:$8 sps:$4 sm:$0xff]   ;;  %v998_v30 = vld [vmem:[#allocation2 + $0x64] ss:$8 sps:$4 sm:$0xff]   ;;  %663 = vmatprep.subr.bf16.mxu0 %v995_v28  ;;  %v1152_v33 = vmov 0  }
  0x27   : > { %s364_s12 = scalar_select %p363_p12, %s1137_s30, 1  ;;  %664 = vmatpush1.bf16.msra.mxu0 %v997_v29  ;;  %v1000_v31 = vld [vmem:[#allocation2 + $0x60] ss:$8 sps:$4 sm:$0xff]   ;;  %v1001_v32 = vld [vmem:[#allocation2 + $0x54] ss:$8 sps:$4 sm:$0xff]   ;;  %695 = vmatprep.mubr.bf16.mxu0 %v1152_v33  ;;  %v433_v46 = vshrl.u32 %v432_v45, 7 }
  0x28   : > { %665 = vmatprep.subr.bf16.mxu0 %v998_v30  ;;  %v1003_v34 = vld [vmem:[#allocation2 + $0x50] ss:$8 sps:$4 sm:$0xff]   ;;  %v1004_v35 = vld [vmem:[#allocation2 + $0x44] ss:$8 sps:$4 sm:$0xff]   ;;  %v1006_v36 = vld [vmem:[#allocation2 + $0x40] ss:$8 sps:$4 sm:$0xff]  }
  0x29   : > { %s921_s14 = smul.u32 12, %s364_s12  ;;  %v1007_v37 = vld [vmem:[#allocation2 + $0x34] ss:$8 sps:$4 sm:$0xff]   ;;  %v1009_v38 = vld [vmem:[#allocation2 + $0x30] ss:$8 sps:$4 sm:$0xff]   ;;  %v456_v47 = vsub.s32 3, %v433_v46 }
  0x2a   : > { %v1010_v39 = vld [vmem:[#allocation2 + $0x24] ss:$8 sps:$4 sm:$0xff]   ;;  %v1012_v40 = vld [vmem:[#allocation2 + $0x20] ss:$8 sps:$4 sm:$0xff]   ;;  %v1013_v41 = vld [vmem:[#allocation2 + $0x14] ss:$8 sps:$4 sm:$0xff]  }
  0x2b   : > { %s371_s23 = scalar_lea.vmem %s1389_s0, %s921_s14  ;;  %s380_s22 = scalar_lea.vmem %s1390_s1, %s921_s14  ;;  %666 = vmatpush1.bf16.msra.mxu0 %v1000_v31  ;;  %v1015_v42 = vld [vmem:[#allocation2 + $0x10] ss:$8 sps:$4 sm:$0xff]   ;;  %v1016_v43 = vld [vmem:[#allocation2 + $0x4] ss:$8 sps:$4 sm:$0xff]   ;;  %v1018_v44 = vld [vmem:[#allocation2] ss:$8 sps:$4 sm:$0xff]  }
  0x2c   : > { %v384_v0 = vld [vmem:[%s371_s23 + $0x8] sm:$0x1]  ;;  %v914_v2 = vld [vmem:[%s371_s23] sm:$0xff]   ;;  %667 = vmatprep.subr.bf16.mxu0 %v1001_v32  ;;  %v463_v48 = vsub.s32 4, %v433_v46  ;;  %v483_v49 = vsub.s32 6, %v433_v46  ;;  %v490_v50 = vsub.s32 7, %v433_v46 }
  0x2d   : > { %v387_v1 = vunpack.c.l.bf16 %v384_v0  ;;  %v915_v3 = vunpack.c.l.bf16 %v914_v2  ;;  %v916_v4 = vunpack.c.h.bf16 %v914_v2  ;;  %v390_v14 = vld [vmem:[%s380_s22 + $0x8] sm:$0x1]  ;;  %v918_v15 = vld [vmem:[%s380_s22] sm:$0xff]   ;;  %v473_v52 = vsub.s32 5, %v433_v46  ;;  %s912_s16 = sshll.u32 %s1137_s30, 9  ;;  %s1153_s22 = smov [#allocation5]  }
  0x2e   : > { %v393_v16 = vunpack.c.l.bf16 %v390_v14  ;;  %v919_v18 = vunpack.c.l.bf16 %v918_v15  ;;  %v920_v22 = vunpack.c.h.bf16 %v918_v15  ;;  %v430_v51 = vld [vmem:[%s1391_s2] sm:$0xff]  ;;  %v1300_v53 = vsub.s32 0, %v433_v46  ;;  %s1342_s19 = scalar_lea.hbm %s1397_s8, %s912_s16 }
  0x2f   : > { %v885_v5 = vmul.f32 -1.442695, %v387_v1  ;;  %v883_v6 = vmul.f32 -1.442695, %v915_v3  ;;  %v884_v7 = vmul.f32 -1.442695, %v916_v4  ;;  %668 = vmatpush1.bf16.msra.mxu0 %v1003_v34  ;;  %v457_v55 = vrot.slane %v430_v51, %v456_v47 }
  0x30   : > { %669 = vmatprep.subr.bf16.mxu0 %v1004_v35  ;;  %v1302_v54 = vsub.s32 1, %v433_v46  ;;  %v464_v56 = vrot.slane %v430_v51, %v463_v48  ;;  %v484_v57 = vrot.slane %v430_v51, %v483_v49  ;;  %v491_v58 = vrot.slane %v430_v51, %v490_v50 }
  0x31   : > { %1019 = vpow2.f32 %v885_v5  ;;  %v448_v61 = vsub.s32 2, %v433_v46  ;;  %v474_v62 = vrot.slane %v430_v51, %v473_v52  ;;  %v435_v63 = vrot.slane %v430_v51, %v1300_v53 }
  0x32   : > { %1021 = vpow2.f32 %v883_v6  ;;  %v441_v0 = vrot.slane %v430_v51, %v1302_v54  ;;  %vm511_vm0 = vcmask 1046528   ;;  %vm524_vm1 = vcmask 1045504  }
  0x33   : > { %1023 = vpow2.f32 %v884_v7  ;;  %670 = vmatpush1.bf16.msra.mxu0 %v1006_v36 }
  0x34   : > { %671 = vmatprep.subr.bf16.mxu0 %v1007_v37 }
  0x37   : > { %672 = vmatpush1.bf16.msra.mxu0 %v1009_v38 }
  0x38   : > { %673 = vmatprep.subr.bf16.mxu0 %v1010_v39 }
  0x3b   : > { %674 = vmatpush1.bf16.msra.mxu0 %v1012_v40 }
  0x3c   : > { %675 = vmatprep.subr.bf16.mxu0 %v1013_v41 }
  0x3e   : > { %v1020_v8 = vpop.eup %1019 }
  0x3f   : > { %v1022_v9 = vpop.eup %1021  ;;  %v405_v10 = vadd.f32 1.0, %v1020_v8  ;;  %676 = vmatpush1.bf16.msra.mxu0 %v1015_v42 }
  0x40   : > { %v1024_v11 = vpop.eup %1023  ;;  %v403_v12 = vadd.f32 1.0, %v1022_v9  ;;  %677 = vmatprep.subr.bf16.mxu0 %v1016_v43 }
  0x41   : > { %1025 = vrcp.f32 %v405_v10  ;;  %v404_v13 = vadd.f32 1.0, %v1024_v11  ;;  %v449_v11 = vrot.slane %v430_v51, %v448_v61  ;;  %v887_v61 = vld [vmem:[%s1392_s3] ss:$0 sm:$0xff] }
  0x42   : > { %1027 = vrcp.f32 %v403_v12 }
  0x43   : > { %1029 = vrcp.f32 %v404_v13  ;;  %678 = vmatpush1.bf16.msra.mxu0 %v1018_v44 }
  0x4e   : > { %v1026_v17 = vpop.eup %1025 }
  0x4f   : > { %v1028_v19 = vpop.eup %1027  ;;  %v414_v20 = vmul.f32 %v1026_v17, %v387_v1  ;;  %v886_v1 = vld [vmem:[%s1391_s2 + $0x8] ss:$0 sm:$0xff] }
  0x50   : > { %v1030_v21 = vpop.eup %1029  ;;  %v412_v23 = vmul.f32 %v1028_v19, %v915_v3 }
  0x51   : > { %v1285_v24 = vadd.f32 %v414_v20, %v393_v16  ;;  %v413_v25 = vmul.f32 %v1030_v21, %v916_v4 }
  0x52   : > { %v1287_v26 = vadd.f32 %v919_v18, %v412_v23 }
  0x53   : > { %422 = vrot.lane.b32.xlu1 %v1285_v24, %s1150_s24  ;;  %v1291_v27 = vadd.f32 %v920_v22, %v413_v25  ;;  %v467_v7 = vmul.f32 %v464_v56, %v1285_v24  ;;  %v494_v9 = vmul.f32 %v491_v58, %v1285_v24 }
  0x54   : > { %418 = vrot.lane.b32.xlu0 %v1287_v26, %s1150_s24  ;;  %v465_v3 = vmul.f32 %v464_v56, %v1287_v26  ;;  %v492_v5 = vmul.f32 %v491_v58, %v1287_v26  ;;  %v442_v19 = vmul.f32 %v441_v0, %v1287_v26 }
  0x55   : > { %v466_v15 = vmul.f32 %v464_v56, %v1291_v27  ;;  %v493_v16 = vmul.f32 %v491_v58, %v1291_v27  ;;  %v443_v22 = vmul.f32 %v441_v0, %v1291_v27  ;;  %v888_v0 = vld [vmem:[%s1393_s4] ss:$0 sm:$0xff] }
  0x57   : > { %424 = vrot.lane.b32.xlu1 %v1287_v26, %s1151_s25 }
  0x58   : > { %420 = vrot.lane.b32.xlu0 %v1291_v27, %s1150_s24  ;;  %s360_s24 = sand.u32 1, %s1129_s28  }
  0x59   : > { %s880_s11 = sshll.u32 %s360_s24, 5  ;;  %s1344_s20 = scalar_lea.sflag [#allocation4], %s360_s24 }
  0x5a   : > { %s362_s12 = scalar_lea.vmem [#allocation5], %s880_s11 }
  0x5b   : > { %428 = vrot.lane.b32.xlu1 %v1285_v24, %s1151_s25  ;;  %s758_s14 = sshll.u32 %s362_s12, 4  ;;  %s1337_s14 = int_to_ptr.vmem [resolvable:$true] %s758_s14 }
  0x5c   : > { %426 = vrot.lane.b32.xlu0 %v1291_v27, %s1151_s25  ;;  %s1065_s30 = scalar_lea.vmem %s1337_s14, 512  ;;  %s1069_s25 = sshll.u32 %s1153_s22, 4  ;;  %s1070_s25 = int_to_ptr.vmem [resolvable:$false] %s1069_s25 }
  0x5d   : > { %p1066_p10 = scmp.ne.s32.totalorder %s1337_s14, %s1065_s30  ;;  %s1071_s26 = scalar_lea.vmem %s1070_s25, 1024 }
  0x5e   : > { %p1072_p0 = scmp.lt.s32.totalorder %s1337_s14, %s1070_s25  ;;  %p1073_p1 = scmp.lt.s32.totalorder %s1071_s26, %s1065_s30 }
  0x5f   : > { %p1067_p11 = pnand %p1066_p10, %p1241_p4 }
  0x60   : > { %p1074_p2 = por %p1073_p1, %p1072_p0 }
  0x61   : > { %p1068_p13 = pneg %p1067_p11 }
  0x63   : > { %p1075_p3 = pnand %p1074_p2, %p1068_p13 }
  0xc5   : > { %v423_v59 = vpop.permute.xlu1 %422 }
  0xc6   : > { %v419_v60 = vpop.permute.xlu0 %418  ;;  %v460_v6 = vmul.f32 %v457_v55, %v423_v59  ;;  %v487_v8 = vmul.f32 %v484_v57, %v423_v59 }
  0xc7   : > { %v458_v2 = vmul.f32 %v457_v55, %v419_v60  ;;  %v485_v4 = vmul.f32 %v484_v57, %v419_v60  ;;  %v436_v24 = vmul.f32 %v435_v63, %v419_v60 }
  0xc8   : > { %v470_v23 = vadd.f32 %v467_v7, %v460_v6  ;;  %v497_v25 = vadd.f32 %v494_v9, %v487_v8 }
  0xc9   : > { %v425_v10 = vpop.permute.xlu1 %424  ;;  %v468_v20 = vadd.f32 %v465_v3, %v458_v2  ;;  %v495_v21 = vadd.f32 %v492_v5, %v485_v4  ;;  %v444_v43 = vadd.f32 %v442_v19, %v436_v24 }
  0xca   : > { %v475_v12 = vmul.f32 %v474_v62, %v425_v10  ;;  %v421_v13 = vpop.permute.xlu0 %420  ;;  %v502_v14 = vmul.f32 %v886_v1, %v425_v10  ;;  %v450_v39 = vmul.f32 %v449_v11, %v425_v10 }
  0xcb   : > { %v459_v17 = vmul.f32 %v457_v55, %v421_v13  ;;  %v486_v18 = vmul.f32 %v484_v57, %v421_v13  ;;  %v437_v28 = vmul.f32 %v435_v63, %v421_v13 }
  0xcc   : > { %v478_v30 = vadd.f32 %v475_v12, %v468_v20  ;;  %v505_v33 = vadd.f32 %v502_v14, %v495_v21  ;;  %v452_v51 = vadd.f32 %v450_v39, %v444_v43 }
  0xcd   : > { %v429_v29 = vpop.permute.xlu1 %428  ;;  %v469_v35 = vadd.f32 %v466_v15, %v459_v17  ;;  %v496_v36 = vadd.f32 %v493_v16, %v486_v18  ;;  %v445_v44 = vadd.f32 %v443_v22, %v437_v28  ;;  %v706_v16 = vld [vmem:[%s1395_s6] sm:$0x3] }
  0xce   : > { %v477_v31 = vmul.f32 %v474_v62, %v429_v29  ;;  %v504_v32 = vmul.f32 %v886_v1, %v429_v29  ;;  %v427_v34 = vpop.permute.xlu0 %426  ;;  %v512_v47 = vrot.slane %v478_v30, 1  ;;  %v525_v48 = vrot.slane %v505_v33, 2  ;;  %v722_v17 = vld [vmem:[%s1396_s7] sm:$0x3] }
  0xcf   : > { %v476_v37 = vmul.f32 %v474_v62, %v427_v34  ;;  %v503_v38 = vmul.f32 %v886_v1, %v427_v34  ;;  %v451_v41 = vmul.f32 %v449_v11, %v427_v34  ;;  %v711_v18 = vrot.slane %v706_v16, %v1300_v53 }
  0xd0   : > { %v480_v26 = vadd.f32 %v477_v31, %v470_v23  ;;  %v507_v40 = vadd.f32 %v504_v32, %v497_v25  ;;  %v727_v19 = vrot.slane %v722_v17, %v1300_v53  ;;  %v715_v20 = vrot.slane %v706_v16, %v1302_v54 }
  0xd1   : > { %v479_v27 = vadd.f32 %v476_v37, %v469_v35  ;;  %v506_v42 = vadd.f32 %v503_v38, %v496_v36  ;;  %v453_v52 = vadd.f32 %v451_v41, %v445_v44  ;;  %v731_v23 = vrot.slane %v722_v17, %v1302_v54 }
  0xd2   : > { %v515_v45 = vrot.slane %v480_v26, 1  ;;  %v528_v46 = vrot.slane %v507_v40, 2 }
  0xd3   : > { %v513_v49 = vrot.slane %v479_v27, 1  ;;  %v526_v50 = vrot.slane %v506_v42, 2 }
  0xd5   : > { %v514_v55 = vsel %vm511_vm0, %v512_v47, %v513_v49  ;;  %v516_v56 = vsel %vm511_vm0, %v513_v49, %v515_v45  ;;  %v527_v57 = vsel %vm524_vm1, %v525_v48, %v526_v50  ;;  %v529_v58 = vsel %vm524_vm1, %v526_v50, %v528_v46 }
  0xd6   : > { %v519_v59 = vadd.f32 %v514_v55, %v452_v51  ;;  %v520_v60 = vadd.f32 %v516_v56, %v453_v52 }
  0xd8   : > { %v532_v62 = vadd.f32 %v527_v57, %v519_v59  ;;  %v533_v63 = vadd.f32 %v529_v58, %v520_v60 }
  0xda   : > { %v542_v1 = vmul.f32 %v887_v61, %v533_v63  ;;  %v541_v2 = vmul.f32 %v887_v61, %v532_v62 }
  0xdc   : > { %v550_v3 = vadd.f32 %v888_v0, %v541_v2  ;;  %v551_v4 = vadd.f32 %v888_v0, %v542_v1 }
  0xde   : > { %v889_v5 = vmul.f32 -1.442695, %v550_v3  ;;  %v890_v6 = vmul.f32 -1.442695, %v551_v4 }
  0xe0   : > { %1031 = vpow2.f32 %v889_v5 }
  0xe1   : > { %1033 = vpow2.f32 %v890_v6 }
  0xed   : > { %v1032_v7 = vpop.eup %1031 }
  0xee   : > { %v1034_v8 = vpop.eup %1033  ;;  %v558_v9 = vadd.f32 1.0, %v1032_v7 }
  0xef   : > { %v559_v10 = vadd.f32 1.0, %v1034_v8 }
  0xf0   : > { %1035 = vrcp.f32 %v558_v9 }
  0xf1   : > { %1037 = vrcp.f32 %v559_v10 }
  0xfd   : > { %v1036_v11 = vpop.eup %1035 }
  0xfe   : > { %v1038_v12 = vpop.eup %1037  ;;  %v564_v13 = vmul.f32 %v1036_v11, %v550_v3 }
  0xff   : > { %v565_v14 = vmul.f32 %v1038_v12, %v551_v4 }
 0x101   : > { %v566_v15 = vpack.c.bf16 %v565_v14, %v564_v13 }
 0x103   : > { %696 = vmatmul.mubr.bf16.vlgmr.msra.gmra.mxu0 %v566_v15 }
 0x1c3   : > { %v697_v21 = vpop.f32.mrf.mxu0 }
 0x1c4   : > { %v718_v22 = vmul.f32 %v711_v18, %v697_v21 }
 0x1c5   : > { %v699_v25 = vpop.f32.mrf.mxu0 }
 0x1c6   : > { %v734_v24 = vadd.f32 %v727_v19, %v718_v22  ;;  %v719_v28 = vmul.f32 %v715_v20, %v699_v25 }
 0x1c7   : > { %v701_v29 = vpop.f32.mrf.mxu0 }
 0x1c8   : > { %738 = vst [vmem:[%s362_s12] sm:$0xff] %v734_v24  ;;  %v735_v30 = vadd.f32 %v731_v23, %v719_v28  ;;  %v720_v31 = vmul.f32 %v711_v18, %v701_v29 }
 0x1c9   : > { %v703_v32 = vpop.f32.mrf.mxu0 }
 0x1ca   : > { %739 = vst [vmem:[%s362_s12 + $0x8] sm:$0xff] %v735_v30  ;;  %v736_v53 = vadd.f32 %v727_v19, %v720_v31  ;;  %v721_v33 = vmul.f32 %v715_v20, %v703_v32 }
 0x1cc   : > { %740 = vst [vmem:[%s362_s12 + $0x10] sm:$0xff] %v736_v53  ;;  %v737_v54 = vadd.f32 %v731_v23, %v721_v33 }
 0x1ce   : > { %741 = vst [vmem:[%s362_s12 + $0x18] sm:$0xff] %v737_v54 }
 0x1cf   : > { %1078 = shalt.err (!%p1075_p3)
}
 0x1d0   : > { %s1079_s24 = scalar_lea.hbm %s1342_s19, 512  ;;  %s1083_s16 = scalar_lea.hbm %s1397_s8, 1024 }
 0x1d1   : > { %p1080_p5 = scmp.ne.s32.totalorder %s1342_s19, %s1079_s24  ;;  %p1084_p9 = scmp.lt.s32.totalorder %s1342_s19, %s1397_s8 }
 0x1d2   : > { %p1085_p12 = scmp.lt.s32.totalorder %s1083_s16, %s1079_s24 }
 0x1d3   : > { %p1081_p6 = pnand %p1080_p5, %p1241_p4 }
 0x1d4   : > { %p1086_p10 = por %p1085_p12, %p1084_p9 }
 0x1d5   : > { %p1082_p7 = pneg %p1081_p6 }
 0x1d7   : > { %p1087_p11 = pnand %p1086_p10, %p1082_p7 }
 0x1d9   : > { %1090 = shalt.err (!%p1087_p11)
}
 0x1da   : > { %s1154_s30 = smov 256   ;;  %s1155_s22 = smov 16  }
 0x1db   : > { %926 = dma.vmem_to_hbm [thread:$0]  (%p1241_p4), %s1337_s14, 512, %s1342_s19, %s1344_s20, %s1154_s30, %s1154_s30, %s1155_s22  }
 0x1dc PF: > { %p938_p13 = scmp.ge.s32.totalorder %s1145_s10, 2  ;;  %s773_s25 = sand.u32 1, %s1125_s27  }
 0x1dd   : > { %s774_s26 = scalar_lea.sflag [#allocation4], %s773_s25 }
 0x1de   : > { %p933_p0 = pnand %p938_p13, %p1248_p8 }
 0x1e0   : > { %p934_p1 = pneg %p933_p0 }
 0x1e2   : > { %1120 = dma.done.wait (%p934_p1), %s774_s26, 512  }
 0x1e3   : > { %1122 = vsyncadd (%p934_p1), %s774_s26, 4294966784  ;;  %s22_s10 = sadd.s32 1, %s1145_s10   ;;  %s1402_s27 = smov %s1129_s28 }
 0x1e4   : > { %p19_p2 = scmp.ge.s32.totalorder %s22_s10, 4   ;;  %s1403_s28 = smov %s1133_s29 }
 0x1e5   : > { %s1404_s29 = smov %s1254_s18  ;;  %s1405_s30 = smov %s1141_s9 }
 0x1e6   : > { %s1406_s9 = smov %s1408_s13  ;;  %21 = sbr.rel (!%p19_p2) target bundleno = 5 (0x5), region = 95 }
 0x1eb   :  { %779 = vsyncpa [#allocation3], 1 }
 0x1ec   :  { %781 = vsyncpa [#allocation3 + $0x1], 1 }
 0x1ed   :  { %782 = vsyncpa [#allocation4], 1 }
 0x1ee   :  { %784 = vsyncpa [#allocation4 + $0x1], 1 }

</bundles_post_ra>
